<compile_context>
chip_gen: v6e
topology: v6e:2x2x1
jax: 0.10.0
libtpu: 0.0.40
codegen_flags: <defaults>
</compile_context>

<pallas_src>
import functools

import jax
import jax.numpy as jnp
from jax.experimental import pallas as pl
from jax.experimental.pallas import tpu as pltpu

LANE = 128
SUBLANE = 8


def _round_up(x, m):
    return (x + m - 1) // m * m


# --------------------------------------------------------------------------
# Kernel: full 3-layer MLP on one batch tile.  All params are VMEM-resident.
# --------------------------------------------------------------------------
def policy_kernel(state_ref, w1_ref, b1_ref, w2_ref, b2_ref, w3_ref, b3_ref,
                  out_ref):
    x = state_ref[...]                                            # (TM, S) f32
    # Layer 1: Linear + ReLU  (MXU matmul, f32 accumulate; VPU epilogue)
    h1 = jnp.dot(x, w1_ref[...], preferred_element_type=jnp.float32)
    h1 = jnp.maximum(h1 + b1_ref[...], 0.0)                       # (TM, H)
    # Layer 2: Linear + ReLU
    h2 = jnp.dot(h1, w2_ref[...], preferred_element_type=jnp.float32)
    h2 = jnp.maximum(h2 + b2_ref[...], 0.0)                       # (TM, H)
    # Layer 3: Linear + tanh (tanh -> EUP); output tile is lane-dense (A_pad=128)
    y = jnp.dot(h2, w3_ref[...], preferred_element_type=jnp.float32)
    y = jnp.tanh(y + b3_ref[...])                                 # (TM, A_pad)
    out_ref[...] = y.astype(out_ref.dtype)


# --------------------------------------------------------------------------
# One-time parameter preparation (hoisted out of the per-call hot path).
# --------------------------------------------------------------------------
def prepare_params(params):
    """Cast everything to f32 and pad the last layer's action dim to 128 lanes.

    Padded weight/bias columns are zero, so padded output lanes hold tanh(0)=0
    and are sliced off in the wrapper.  Call once; reuse the result.
    """
    w1, b1, w2, b2, w3, b3 = params
    H, A = w3.shape
    A_pad = _round_up(A, LANE)
    w3p = jnp.zeros((H, A_pad), jnp.float32).at[:, :A].set(w3.astype(jnp.float32))
    b3p = jnp.zeros((1, A_pad), jnp.float32).at[:, :A].set(b3.astype(jnp.float32))
    return (w1.astype(jnp.float32), b1.astype(jnp.float32),
            w2.astype(jnp.float32), b2.astype(jnp.float32),
            w3p, b3p)


# --------------------------------------------------------------------------
# Forward wrapper.
# --------------------------------------------------------------------------
@functools.partial(jax.jit,
                   static_argnames=("num_actions", "block_m",
                                    "min_pallas_batch"))
def policy_forward(state, prepared_params, *, num_actions, block_m=2048,
                   min_pallas_batch=64):
    w1, b1, w2, b2, w3p, b3p = prepared_params
    B, S = state.shape
    H = w1.shape[1]
    A_pad = w3p.shape[1]
    A = num_actions

    state = state.astype(jnp.float32)

    # Tiny-batch fallback: XLA-fused path beats pallas_call launch + DMA setup.
    if B < min_pallas_batch:
        x = jnp.maximum(state @ w1 + b1, 0.0)
        x = jnp.maximum(x @ w2 + b2, 0.0)
        return jnp.tanh(x @ w3p + b3p)[:, :A]

    # Batch tiling: take the whole (8-row-aligned) batch as one tile up to
    # block_m rows; per-tile VMEM footprint at tm=2048 is < 3 MiB even
    # double-buffered, well inside v7x's 64 MiB.
    tm = min(block_m, _round_up(B, SUBLANE))
    grid_m = pl.cdiv(B, tm)
    B_pad = grid_m * tm
    if B_pad != B:
        state = jnp.pad(state, ((0, B_pad - B), (0, 0)))

    # Weights/biases: full-array blocks, constant index_map -> VMEM-resident
    # across all batch-grid iterations.
    const = lambda shape: pl.BlockSpec(shape, lambda i: (0,) * len(shape))

    cost = pl.CostEstimate(
        flops=2 * B_pad * (S * H + H * H + H * A_pad),
        transcendentals=B_pad * A_pad,
        bytes_accessed=4 * (B_pad * S + B_pad * A_pad
                            + S * H + H + H * H + H + H * A_pad + A_pad),
    )

    out = pl.pallas_call(
        policy_kernel,
        out_shape=jax.ShapeDtypeStruct((B_pad, A_pad), jnp.float32),
        grid=(grid_m,),
        in_specs=[
            pl.BlockSpec((tm, S), lambda i: (i, 0)),      # state tile
            const((S, H)), const((1, H)),                 # w1, b1
            const((H, H)), const((1, H)),                 # w2, b2
            const((H, A_pad)), const((1, A_pad)),         # w3, b3 (lane-padded)
        ],
        out_specs=pl.BlockSpec((tm, A_pad), lambda i: (i, 0)),
        compiler_params=pltpu.CompilerParams(
            dimension_semantics=("parallel",)),
        cost_estimate=cost,
    )(state, w1, b1, w2, b2, w3p, b3p)

    return out[:B, :A]


# --------------------------------------------------------------------------
# Parameter init (mimics PyTorch defaults: uniform +/- 1/sqrt(fan_in) for
# layers 1-2, uniform +/- init_w for the final layer).
# --------------------------------------------------------------------------
def init_params(key, num_states, num_actions, hidden_size, init_w=0.003):
    k1, k2, k3, k4, k5, k6 = jax.random.split(key, 6)

    def unif(k, shape, bound):
        return jax.random.uniform(k, shape, jnp.float32, -bound, bound)

    bnd1 = 1.0 / jnp.sqrt(num_states)
    bnd2 = 1.0 / jnp.sqrt(hidden_size)
    # Weights stored as (in, out) so the kernel computes x @ W.
    w1 = unif(k1, (num_states, hidden_size), bnd1)
    b1 = unif(k2, (1, hidden_size), bnd1)
    w2 = unif(k3, (hidden_size, hidden_size), bnd2)
    b2 = unif(k4, (1, hidden_size), bnd2)
    w3 = unif(k5, (hidden_size, num_actions), init_w)
    b3 = unif(k6, (1, num_actions), init_w)
    return (w1, b1, w2, b2, w3, b3)


def reference_forward(state, params):
    w1, b1, w2, b2, w3, b3 = params
    x = jnp.maximum(state @ w1 + b1, 0.0)
    x = jnp.maximum(x @ w2 + b2, 0.0)
    return jnp.tanh(x @ w3 + b3)


if __name__ == "__main__":
    num_states, num_actions, hidden_size = 16, 4, 32
    batch = 2

    key = jax.random.PRNGKey(0)
    pkey, skey, skey2 = jax.random.split(key, 3)
    params = init_params(pkey, num_states, num_actions, hidden_size)
    prepared = prepare_params(params)          # one-time: cast + lane-pad

    # 1) Small-shape check THROUGH the Pallas kernel (force min_pallas_batch=0).
    state = jax.random.normal(skey, (batch, num_states), jnp.float32)
    out = jax.block_until_ready(
        policy_forward(state, prepared, num_actions=num_actions,
                       min_pallas_batch=0))
    ref = reference_forward(state, params)
    assert out.shape == (batch, num_actions)
    assert jnp.allclose(out, ref, atol=2e-2, rtol=2e-2), "mismatch (pallas, B=2)"

    # 2) Default path for tiny batch (XLA-fused fallback).
    out_fb = jax.block_until_ready(
        policy_forward(state, prepared, num_actions=num_actions))
    assert jnp.allclose(out_fb, ref, atol=2e-2, rtol=2e-2), "mismatch (fallback)"

    # 3) Larger batch: single large tile through the Pallas path, exercises
    #    batch padding (300 -> 304 rows) and the lane-dense padded output.
    big = jax.random.normal(skey2, (300, num_states), jnp.float32)
    out_big = jax.block_until_ready(
        policy_forward(big, prepared, num_actions=num_actions))
    ref_big = reference_forward(big, params)
    assert out_big.shape == (300, num_actions)
    assert jnp.allclose(out_big, ref_big, atol=2e-2, rtol=2e-2), \
        "mismatch (batched pallas)"

    print("KERNEL_OK")
</pallas_src>

<mosaic_0001>
module attributes {stable_mosaic.version = 11 : i64} {
  func.func @policy_kernel(%arg0: i32, %arg1: memref<8x16xf32, #tpu.memory_space<vmem>>, %arg2: memref<16x32xf32, #tpu.memory_space<vmem>>, %arg3: memref<1x32xf32, #tpu.memory_space<vmem>>, %arg4: memref<32x32xf32, #tpu.memory_space<vmem>>, %arg5: memref<1x32xf32, #tpu.memory_space<vmem>>, %arg6: memref<32x128xf32, #tpu.memory_space<vmem>>, %arg7: memref<1x128xf32, #tpu.memory_space<vmem>>, %arg8: memref<8x128xf32, #tpu.memory_space<vmem>>) attributes {dimension_semantics = [#tpu.dimension_semantics<parallel>], iteration_bounds = array<i64: 1>, scalar_prefetch = 0 : i64, scratch_operands = 0 : i64, tpu.core_type = #tpu.core_type<tc>, window_params = [{transform_indices = @transform_0, window_bounds = array<i64: 8, 16>}, {pipeline_mode = #tpu.pipeline_mode<synchronous>, transform_indices = @transform_1, window_bounds = array<i64: 16, 32>}, {pipeline_mode = #tpu.pipeline_mode<synchronous>, transform_indices = @transform_2, window_bounds = array<i64: 1, 32>}, {pipeline_mode = #tpu.pipeline_mode<synchronous>, transform_indices = @transform_3, window_bounds = array<i64: 32, 32>}, {pipeline_mode = #tpu.pipeline_mode<synchronous>, transform_indices = @transform_4, window_bounds = array<i64: 1, 32>}, {pipeline_mode = #tpu.pipeline_mode<synchronous>, transform_indices = @transform_5, window_bounds = array<i64: 32, 128>}, {pipeline_mode = #tpu.pipeline_mode<synchronous>, transform_indices = @transform_6, window_bounds = array<i64: 1, 128>}, {transform_indices = @transform_7, window_bounds = array<i64: 8, 128>}]} {
    %c0 = arith.constant 0 : index
    %c0_0 = arith.constant 0 : index
    %0 = vector.load %arg1[%c0, %c0_0] : memref<8x16xf32, #tpu.memory_space<vmem>>, vector<8x16xf32>
    %c0_1 = arith.constant 0 : index
    %c0_2 = arith.constant 0 : index
    %1 = vector.load %arg2[%c0_1, %c0_2] : memref<16x32xf32, #tpu.memory_space<vmem>>, vector<16x32xf32>
    %cst = arith.constant dense<0.000000e+00> : vector<8x32xf32>
    %2 = tpu.matmul %0, %1, %cst {dimension_numbers = #tpu.dot_dimension_numbers<[1], [0], [0], [1], [0, 0, 1, 1], [], []>} : vector<8x16xf32>, vector<16x32xf32>, vector<8x32xf32> -> vector<8x32xf32>
    %c0_3 = arith.constant 0 : index
    %c0_4 = arith.constant 0 : index
    %3 = vector.load %arg3[%c0_3, %c0_4] : memref<1x32xf32, #tpu.memory_space<vmem>>, vector<1x32xf32>
    %4 = vector.broadcast %3 : vector<1x32xf32> to vector<8x32xf32>
    %5 = arith.addf %2, %4 : vector<8x32xf32>
    %cst_5 = arith.constant 0.000000e+00 : f32
    %6 = vector.broadcast %cst_5 : f32 to vector<8x32xf32>
    %7 = arith.maximumf %5, %6 : vector<8x32xf32>
    %c0_6 = arith.constant 0 : index
    %c0_7 = arith.constant 0 : index
    %8 = vector.load %arg4[%c0_6, %c0_7] : memref<32x32xf32, #tpu.memory_space<vmem>>, vector<32x32xf32>
    %cst_8 = arith.constant dense<0.000000e+00> : vector<8x32xf32>
    %9 = tpu.matmul %7, %8, %cst_8 {dimension_numbers = #tpu.dot_dimension_numbers<[1], [0], [0], [1], [0, 0, 1, 1], [], []>} : vector<8x32xf32>, vector<32x32xf32>, vector<8x32xf32> -> vector<8x32xf32>
    %c0_9 = arith.constant 0 : index
    %c0_10 = arith.constant 0 : index
    %10 = vector.load %arg5[%c0_9, %c0_10] : memref<1x32xf32, #tpu.memory_space<vmem>>, vector<1x32xf32>
    %11 = vector.broadcast %10 : vector<1x32xf32> to vector<8x32xf32>
    %12 = arith.addf %9, %11 : vector<8x32xf32>
    %cst_11 = arith.constant 0.000000e+00 : f32
    %13 = vector.broadcast %cst_11 : f32 to vector<8x32xf32>
    %14 = arith.maximumf %12, %13 : vector<8x32xf32>
    %c0_12 = arith.constant 0 : index
    %c0_13 = arith.constant 0 : index
    %15 = vector.load %arg6[%c0_12, %c0_13] : memref<32x128xf32, #tpu.memory_space<vmem>>, vector<32x128xf32>
    %cst_14 = arith.constant dense<0.000000e+00> : vector<8x128xf32>
    %16 = tpu.matmul %14, %15, %cst_14 {dimension_numbers = #tpu.dot_dimension_numbers<[1], [0], [0], [1], [0, 0, 1, 1], [], []>} : vector<8x32xf32>, vector<32x128xf32>, vector<8x128xf32> -> vector<8x128xf32>
    %c0_15 = arith.constant 0 : index
    %c0_16 = arith.constant 0 : index
    %17 = vector.load %arg7[%c0_15, %c0_16] : memref<1x128xf32, #tpu.memory_space<vmem>>, vector<1x128xf32>
    %18 = vector.broadcast %17 : vector<1x128xf32> to vector<8x128xf32>
    %19 = arith.addf %16, %18 : vector<8x128xf32>
    %20 = math.tanh %19 : vector<8x128xf32>
    %c0_17 = arith.constant 0 : index
    %c0_18 = arith.constant 0 : index
    %21 = vector.load %arg8[%c0_17, %c0_18] : memref<8x128xf32, #tpu.memory_space<vmem>>, vector<8x128xf32>
    tpu.vector_store %arg8[%c0_17, %c0_18], %20 {strides = array<i32>} : memref<8x128xf32, #tpu.memory_space<vmem>>, vector<8x128xf32>,
    return
  }
  func.func @transform_0(%arg0: i32) -> (i32, i32) {
    %c0_i32 = arith.constant 0 : i32
    %c0_i32_0 = arith.constant 0 : i32
    return %arg0, %c0_i32 : i32, i32
  }
  func.func @transform_1(%arg0: i32) -> (i32, i32) {
    %c0_i32 = arith.constant 0 : i32
    %c0_i32_0 = arith.constant 0 : i32
    %c0_i32_1 = arith.constant 0 : i32
    return %c0_i32, %c0_i32_0 : i32, i32
  }
  func.func @transform_2(%arg0: i32) -> (i32, i32) {
    %c0_i32 = arith.constant 0 : i32
    %c0_i32_0 = arith.constant 0 : i32
    %c0_i32_1 = arith.constant 0 : i32
    return %c0_i32, %c0_i32_0 : i32, i32
  }
  func.func @transform_3(%arg0: i32) -> (i32, i32) {
    %c0_i32 = arith.constant 0 : i32
    %c0_i32_0 = arith.constant 0 : i32
    %c0_i32_1 = arith.constant 0 : i32
    return %c0_i32, %c0_i32_0 : i32, i32
  }
  func.func @transform_4(%arg0: i32) -> (i32, i32) {
    %c0_i32 = arith.constant 0 : i32
    %c0_i32_0 = arith.constant 0 : i32
    %c0_i32_1 = arith.constant 0 : i32
    return %c0_i32, %c0_i32_0 : i32, i32
  }
  func.func @transform_5(%arg0: i32) -> (i32, i32) {
    %c0_i32 = arith.constant 0 : i32
    %c0_i32_0 = arith.constant 0 : i32
    %c0_i32_1 = arith.constant 0 : i32
    return %c0_i32, %c0_i32_0 : i32, i32
  }
  func.func @transform_6(%arg0: i32) -> (i32, i32) {
    %c0_i32 = arith.constant 0 : i32
    %c0_i32_0 = arith.constant 0 : i32
    %c0_i32_1 = arith.constant 0 : i32
    return %c0_i32, %c0_i32_0 : i32, i32
  }
  func.func @transform_7(%arg0: i32) -> (i32, i32) {
    %c0_i32 = arith.constant 0 : i32
    %c0_i32_0 = arith.constant 0 : i32
    return %arg0, %c0_i32 : i32, i32
  }
}

</mosaic_0001>

<bundles_post_ra>
// kernel: policy_forward.1
= control target key start
LH: loop header
LB: loop body
LE: loop exit
PB: predicated region body
PF: predicated region fallthrough
CT: control target
= control target key end

     0   :  { %12 = vsyncpa [#allocation3], 0  ;;  %s527_s0 = inlined_call_operand.vmem [shape: f32[8,16], index: 0, kind: input, shape index: {}]   ;;  %s528_s1 = inlined_call_operand.hbm [shape: f32[16,32], index: 1, kind: input, shape index: {}]   ;;  %s529_s2 = inlined_call_operand.vmem [shape: f32[1,32], index: 2, kind: input, shape index: {}]   ;;  %s530_s3 = inlined_call_operand.hbm [shape: f32[32,32], index: 3, kind: input, shape index: {}]   ;;  %s531_s4 = inlined_call_operand.vmem [shape: f32[1,32], index: 4, kind: input, shape index: {}]   ;;  %s532_s5 = inlined_call_operand.hbm [shape: f32[32,128], index: 5, kind: input, shape index: {}]   ;;  %s533_s6 = inlined_call_operand.vmem [shape: f32[1,128], index: 6, kind: input, shape index: {}]   ;;  %s534_s7 = inlined_call_operand.vmem [shape: f32[8,128], index: 7, kind: output, shape index: {}]  }
   0x1   :  { %13 = vsyncpa [#allocation5], 0  ;;  %s451_s24 = smov [#allocation4]   ;;  %s452_s26 = smov [#allocation2]  }
   0x2   :  { %s35_s25 = sshll.u32 %s451_s24, 4  ;;  %s21_s27 = sshll.u32 %s452_s26, 4  ;;  %s36_s25 = int_to_ptr.vmem [resolvable:$true] %s35_s25  ;;  %s22_s27 = int_to_ptr.vmem [resolvable:$true] %s21_s27 }
   0x3   :  { %s395_s28 = scalar_lea.vmem %s36_s25, 512  ;;  %p400_p1 = scmp.lt.s32.totalorder %s36_s25, %s36_s25 }
   0x4   :  { %p396_p0 = scmp.ne.s32.totalorder %s36_s25, %s395_s28  ;;  %p401_p2 = scmp.lt.s32.totalorder %s395_s28, %s395_s28 }
   0x6   :  { %p402_p3 = por %p401_p2, %p400_p1 }
   0x8   :  { %p403_p4 = pnand %p402_p3, %p396_p0 }
   0xa   :  { %406 = shalt.err (!%p403_p4)
}
   0xb   :  { %s453_s29 = smov 128   ;;  %s454_s30 = smov 8  }
   0xc   :  { %41 = dma.hbm_to_vmem [thread:$0]  %s530_s3, 512, %s36_s25, [#allocation5], %s453_s29, %s453_s29, %s454_s30  }
   0xd   :  { %s415_s10 = scalar_lea.vmem %s22_s27, 256  ;;  %p420_p6 = scmp.lt.s32.totalorder %s22_s27, %s22_s27 }
   0xe   :  { %p416_p5 = scmp.ne.s32.totalorder %s22_s27, %s415_s10  ;;  %p421_p7 = scmp.lt.s32.totalorder %s415_s10, %s415_s10 }
  0x10   :  { %p422_p8 = por %p421_p7, %p420_p6 }
  0x12   :  { %p423_p9 = pnand %p422_p8, %p416_p5 }
  0x14   :  { %426 = shalt.err (!%p423_p9)
}
  0x15   :  { %27 = dma.hbm_to_vmem [thread:$0]  %s528_s1, 256, %s22_s27, [#allocation3], %s453_s29, %s453_s29, %s454_s30  }
  0x16   :  { %s455_s13 = smov [#allocation6]  }
  0x17   :  { %s49_s14 = sshll.u32 %s455_s13, 4  ;;  %s50_s14 = int_to_ptr.vmem [resolvable:$true] %s49_s14 }
  0x18   :  { %s435_s15 = scalar_lea.vmem %s50_s14, 512  ;;  %p440_p11 = scmp.lt.s32.totalorder %s50_s14, %s50_s14 }
  0x19   :  { %p436_p10 = scmp.ne.s32.totalorder %s50_s14, %s435_s15  ;;  %p441_p12 = scmp.lt.s32.totalorder %s435_s15, %s435_s15 }
  0x1b   :  { %p442_p13 = por %p441_p12, %p440_p11 }
  0x1d   :  { %p443_p0 = pnand %p442_p13, %p436_p10 }
  0x1f   :  { %446 = shalt.err (!%p443_p0)
}
  0x20   :  { %55 = dma.hbm_to_vmem [thread:$0]  %s532_s5, 512, %s50_s14, [#allocation5], %s453_s29, %s453_s29, %s454_s30  }
  0x21   :  { %447 = dma.done.wait [#allocation3], 256  }
  0x22   :  { %448 = vsyncadd [#allocation3], 4294967040 }
  0x23   :  { %449 = dma.done.wait [#allocation5], 1024  }
  0x24   :  { %450 = vsyncadd [#allocation5], 4294966272  ;;  %v456_v0 = vmov 0.0   ;;  %vm457_vm0 = vmmov 0   ;;  %v69_v1 = vld [vmem:[#allocation2 + $0x8] sm:$0xff]  ;;  %v68_v2 = vld [vmem:[#allocation2] sm:$0xff] }
  0x25   :  { %349 = vmatprep.subr.mxu0 %v456_v0  ;;  %353 = vmatprep.mubr.msk.f32.mxu0 %vm457_vm0, %v456_v0  ;;  %v67_v3 = vld [vmem:[%s527_s0] sm:$0xff]  ;;  %vm77_vm1 = vcmask 130048   ;;  %v155_v4 = vld [vmem:[#allocation4 + $0x18] sm:$0xff]  ;;  %v153_v6 = vld [vmem:[#allocation4 + $0x8] sm:$0xff]  ;;  %vm163_vm2 = vcmask 261120  }
  0x26   :  { %356 = vmatprep.subr.mxu1 %v456_v0  ;;  %364 = vmatprep.mubr.msk.f32.mxu1 %vm457_vm0, %v456_v0  ;;  %v154_v5 = vld [vmem:[#allocation4 + $0x10] sm:$0xff]  ;;  %v152_v7 = vld [vmem:[#allocation4] sm:$0xff]  ;;  %v241_v8 = vld [vmem:[#allocation6 + $0x18] sm:$0xff] }
  0x27   :  { %350 = vmatpush3.msra.mxu0 %v69_v1  ;;  %357 = vmatpush3.msra.mxu1 %v155_v4  ;;  %v330_v9 = vld [vmem:[%s529_s2] ss:$0 sm:$0xff]  ;;  %v239_v15 = vld [vmem:[#allocation6 + $0x8] sm:$0xff]  ;;  %v238_v16 = vld [vmem:[#allocation6] sm:$0xff] }
  0x28   :  { %351 = vmatprep.subr.mxu0 %v456_v0  ;;  %358 = vmatprep.subr.mxu1 %v456_v0  ;;  %v240_v14 = vld [vmem:[#allocation6 + $0x10] sm:$0xff] }
  0x29   :  { %352 = vmatpush3.msra.mxu0 %v68_v2  ;;  %359 = vmatpush3.msra.mxu1 %v154_v5  ;;  %v332_v17 = vld [vmem:[%s531_s4] ss:$0 sm:$0xff] }
  0x2a   :  { %354 = vmatmul.mubr.msk.f32.vlgmr.msra.gmra.mxu0 %vm77_vm1, %v67_v3  ;;  %367 = vmatprep.subr.mxu0 %v456_v0  ;;  %v334_v22 = vld [vmem:[%s533_s6] ss:$0 sm:$0xff] }
  0x2b   :  { %375 = vmatprep.mubr.msk.f32.mxu0 %vm457_vm0, %v456_v0  ;;  %360 = vmatprep.subr.mxu1 %v456_v0 }
  0x2c   :  { %361 = vmatpush3.msra.mxu1 %v153_v6  ;;  %368 = vmatpush3.msra.mxu0 %v241_v8 }
  0x2d   :  { %362 = vmatprep.subr.mxu1 %v456_v0  ;;  %369 = vmatprep.subr.mxu0 %v456_v0 }
  0x2e   :  { %363 = vmatpush3.msra.mxu1 %v152_v7  ;;  %370 = vmatpush3.msra.mxu0 %v240_v14 }
  0x2f   :  { %371 = vmatprep.subr.mxu0 %v456_v0 }
  0x30   :  { %372 = vmatpush3.msra.mxu0 %v239_v15 }
  0x31   :  { %373 = vmatprep.subr.mxu0 %v456_v0 }
  0x32   :  { %374 = vmatpush3.msra.mxu0 %v238_v16 }
  0xea   :  { %v147_v10 = vpop.f32.mrf.mxu0 }
  0xeb   :  { %v148_v11 = vadd.f32 %v330_v9, %v147_v10 }
  0xec   :  { %v355_v12 = vpop.f32.mrf.mxu0 }
  0xed   :  { %v151_v13 = vmax.f32 %v148_v11, 0.0 }
  0xef   :  { %365 = vmatmul.mubr.msk.f32.vlgmr.msra.gmra.mxu1 %vm163_vm2, %v151_v13 }
 0x1af   :  { %v233_v18 = vpop.f32.mrf.mxu1 }
 0x1b0   :  { %v234_v19 = vadd.f32 %v332_v17, %v233_v18 }
 0x1b1   :  { %v366_v20 = vpop.f32.mrf.mxu1 }
 0x1b2   :  { %v237_v21 = vmax.f32 %v234_v19, 0.0 }
 0x1b4   :  { %376 = vmatmul.mubr.msk.f32.vlgmr.msra.gmra.mxu0 %vm163_vm2, %v237_v21 }
 0x274   :  { %v318_v23 = vpop.f32.mrf.mxu0 }
 0x275   :  { %v319_v24 = vadd.f32 %v334_v22, %v318_v23 }
 0x276   :  { %v377_v25 = vpop.f32.mrf.mxu0 }
 0x277   :  { %385 = vtanh.f32 %v319_v24 }
 0x284   :  { %v386_v26 = vpop.eup %385 }
 0x285   :  { %323 = vst [vmem:[%s534_s7] sm:$0xff] %v386_v26 }
 0x286   :  { %328 = vsyncpa [#allocation3], 1 }
 0x287   :  { %329 = vsyncpa [#allocation5], 1 }

</bundles_post_ra>
